<compile_context>
chip_gen: v7x
topology: tpu7x:2x2x1
jax: 0.10.0
libtpu: 0.0.40
codegen_flags: <defaults>
</compile_context>

<pallas_src>
import functools

import jax
import jax.numpy as jnp
from jax.experimental import pallas as pl
from jax.experimental.pallas import tpu as pltpu

BN_EPS = 1e-5


def _round_up(x, m):
    return (x + m - 1) // m * m


def _pad2(a, rows, cols):
    r, c = a.shape
    return jnp.pad(a, ((0, rows - r), (0, cols - c)))


def _fold_bn(w, b, g, be, m, v):
    """Fold eval-mode BatchNorm1d into the preceding Linear (x @ W + b)."""
    scale = g * jax.lax.rsqrt(v + BN_EPS)        # (1, H)
    return w * scale, (b - m) * scale + be


# ----------------------------------------------------------------------------
# Kernel
# ----------------------------------------------------------------------------
def decoder_kernel(x_ref, w0_ref, b0_ref, w1_ref, b1_ref, w2_ref, b2_ref,
                   alpha_ref, out_ref, *scratch, cache_h):
    def compute_h():
        a0 = alpha_ref[0]
        a1 = alpha_ref[1]
        h = jnp.dot(x_ref[...], w0_ref[...], preferred_element_type=jnp.float32)
        h = h + b0_ref[...]
        h = jnp.where(h > 0, h, a0 * h)          # PReLU (single shared alpha)
        h = jnp.dot(h, w1_ref[...], preferred_element_type=jnp.float32)
        h = h + b1_ref[...]
        h = jnp.where(h > 0, h, a1 * h)
        return h

    def emit(h_f32):
        # bf16 x bf16 MXU path, f32 accumulation.
        y = jnp.dot(h_f32.astype(jnp.bfloat16), w2_ref[...],
                    preferred_element_type=jnp.float32)
        out_ref[...] = (y + b2_ref[...]).astype(out_ref.dtype)

    if cache_h:
        h_ref = scratch[0]

        @pl.when(pl.program_id(1) == 0)
        def _():
            h = compute_h()
            h_ref[...] = h
            emit(h)                  # use in-register h; skip store->load round trip

        @pl.when(pl.program_id(1) != 0)
        def _():
            emit(h_ref[...])
    else:
        # Single batch tile: recompute h each step so the n_genes axis can be
        # "parallel" (v7x second TensorCore gets work).
        emit(compute_h())


# ----------------------------------------------------------------------------
# Host-side tiling heuristics
# ----------------------------------------------------------------------------
def _pick_tm(B):
    """Batch tile: minimize batch padding, tie-break toward larger tm
    (fewer w2 re-reads from HBM)."""
    b8 = _round_up(B, 8)
    cands = sorted({c for c in (min(b8, 512), 128, 256, 512) if c <= b8})
    return min(cands, key=lambda c: (_round_up(B, c) - B, -c))


def _pick_tn(NG, tm):
    """n_genes tile: larger when the batch tile is tiny (amortize per-step
    overhead and the w2 DMA)."""
    ngp = _round_up(NG, 128)
    if tm <= 64:
        target = 2048
    elif tm <= 256:
        target = 1024
    else:
        target = 512
    return min(ngp, target)


def _vmem_estimate(tm, tn, Lp, H0p, H1p, out_itemsize, cache_h):
    resident = 4 * 2 * (Lp * H0p + H0p * H1p + H0p + H1p)   # w0,w1,b0,b1 (f32, 2-buf)
    x_bytes = 4 * 2 * tm * Lp                                # x tile (f32, 2-buf)
    w2_bytes = 2 * 2 * H1p * tn                              # w2 tile (bf16, 2-buf)
    b2_bytes = 4 * 2 * tn
    out_bytes = out_itemsize * 2 * tm * tn
    scratch = (4 * tm * H1p) if cache_h else 0
    return resident + x_bytes + w2_bytes + b2_bytes + out_bytes + scratch


# ----------------------------------------------------------------------------
# Wrapper
# ----------------------------------------------------------------------------
def decoder_forward(x, params, *, tm=None, tn=None, out_dtype=jnp.float32):
    """Fused decoder forward pass (eval mode) on TPU via Pallas."""
    (w0, b0, g0, be0, m0, v0, a0,
     w1, b1, g1, be1, m1, v1, a1,
     w2, b2) = params

    B, L = x.shape
    H0 = w0.shape[1]
    H1 = w1.shape[1]
    NG = w2.shape[1]

    # ---- host-side prep: BN folding + lane-dense zero padding ----
    w0f, b0f = _fold_bn(w0, b0, g0, be0, m0, v0)
    w1f, b1f = _fold_bn(w1, b1, g1, be1, m1, v1)

    # TODO(synk): L/H0/H1 could use full-extent (non-128-padded) blocks; padding
    # kept since these layers run at most once per batch tile.
    Lp = _round_up(L, 128)
    H0p = _round_up(H0, 128)
    H1p = _round_up(H1, 128)

    out_itemsize = jnp.dtype(out_dtype).itemsize

    if tm is None:
        tm = _pick_tm(B)
    Bp = _round_up(B, tm)
    num_i = Bp // tm
    # Cache h across the n_genes axis only when there are >=2 batch tiles;
    # otherwise recompute per step so both grid axes can be "parallel".
    cache_h = num_i >= 2

    if tn is None:
        tn = _pick_tn(NG, tm)
        budget = 40 * (1 << 20)                 # conservative across v5e/v6e/v7x
        while tn > 128 and _vmem_estimate(tm, tn, Lp, H0p, H1p,
                                          out_itemsize, cache_h) > budget:
            tn = max(128, _round_up(tn // 2, 128))
    NGp = _round_up(NG, tn)
    num_j = NGp // tn

    xp = _pad2(x.astype(jnp.float32), Bp, Lp)
    w0p, b0p = _pad2(w0f, Lp, H0p), _pad2(b0f, 1, H0p)
    w1p, b1p = _pad2(w1f, H0p, H1p), _pad2(b1f, 1, H1p)
    # w2 is the dominant HBM stream / MXU work: ship it in bf16.
    w2p = _pad2(w2, H1p, NGp).astype(jnp.bfloat16)
    b2p = _pad2(b2, 1, NGp)
    # PReLU alphas as SMEM scalars.
    alphas = jnp.concatenate([a0.reshape(-1), a1.reshape(-1)]).astype(jnp.float32)

    grid = (num_i, num_j)

    in_specs = [
        pl.BlockSpec((tm, Lp), lambda i, j: (i, 0)),        # x: resident across j
        pl.BlockSpec((Lp, H0p), lambda i, j: (0, 0)),       # w0: fully resident
        pl.BlockSpec((1, H0p), lambda i, j: (0, 0)),        # b0 (BN folded)
        pl.BlockSpec((H0p, H1p), lambda i, j: (0, 0)),      # w1: fully resident
        pl.BlockSpec((1, H1p), lambda i, j: (0, 0)),        # b1 (BN folded)
        pl.BlockSpec((H1p, tn), lambda i, j: (0, j)),       # w2 (bf16): streamed
        pl.BlockSpec((1, tn), lambda i, j: (0, j)),         # b2: streamed
        pl.BlockSpec(memory_space=pltpu.MemorySpace.SMEM),  # PReLU alphas (scalars)
    ]
    out_specs = pl.BlockSpec((tm, tn), lambda i, j: (i, j))

    scratch_shapes = [pltpu.VMEM((tm, H1p), jnp.float32)] if cache_h else []

    hidden_flops = 2 * (Lp * H0p + H0p * H1p)
    flops = (Bp * hidden_flops if cache_h else Bp * num_j * hidden_flops) \
            + 2 * Bp * H1p * NGp
    bytes_accessed = (
        4 * Bp * Lp
        + 4 * (Lp * H0p + H0p * H1p + H0p + H1p)
        + num_i * (2 * H1p * NGp + 4 * NGp)      # w2/b2 re-read once per batch tile
        + out_itemsize * Bp * NGp
    )
    cost = pl.CostEstimate(flops=flops, transcendentals=0,
                           bytes_accessed=bytes_accessed)

    est = _vmem_estimate(tm, tn, Lp, H0p, H1p, out_itemsize, cache_h)
    vmem_limit = int(min(64 * (1 << 20), max(est + (8 << 20), 32 << 20)))

    dims = ("parallel", "arbitrary") if cache_h else ("parallel", "parallel")

    out_padded = pl.pallas_call(
        functools.partial(decoder_kernel, cache_h=cache_h),
        out_shape=jax.ShapeDtypeStruct((Bp, NGp), out_dtype),
        grid_spec=pltpu.PrefetchScalarGridSpec(
            num_scalar_prefetch=0,
            grid=grid,
            in_specs=in_specs,
            out_specs=out_specs,
            scratch_shapes=scratch_shapes,
        ),
        compiler_params=pltpu.CompilerParams(
            dimension_semantics=dims,
            vmem_limit_bytes=vmem_limit,
        ),
        cost_estimate=cost,
    )(xp, w0p, b0p, w1p, b1p, w2p, b2p, alphas)

    return out_padded[:B, :NG]


# ----------------------------------------------------------------------------
# Parameters & plain-JAX reference
# ----------------------------------------------------------------------------
def make_params(key, latent_dim, hidden_dim, n_genes):
    """Deterministic synthetic parameters matching the module's __init__ shapes."""
    ks = jax.random.split(key, 16)
    H0, H1 = hidden_dim

    def lin(kw, kb, din, dout):
        # weights stored pre-transposed: [in, out]
        w = jax.random.normal(kw, (din, dout), jnp.float32) * 0.05
        b = jax.random.normal(kb, (1, dout), jnp.float32) * 0.05
        return w, b

    w0, b0 = lin(ks[0], ks[1], latent_dim, H0)
    w1, b1 = lin(ks[2], ks[3], H0, H1)
    w2, b2 = lin(ks[4], ks[5], H1, n_genes)

    def bn(kg, kb, km, kv, dim):
        g = 1.0 + 0.1 * jax.random.normal(kg, (1, dim), jnp.float32)
        be = 0.1 * jax.random.normal(kb, (1, dim), jnp.float32)
        m = 0.1 * jax.random.normal(km, (1, dim), jnp.float32)
        v = jnp.abs(jax.random.normal(kv, (1, dim), jnp.float32)) + 0.5
        return g, be, m, v

    g0, be0, m0, v0 = bn(ks[6], ks[7], ks[8], ks[9], H0)
    g1, be1, m1, v1 = bn(ks[10], ks[11], ks[12], ks[13], H1)

    # PReLU default init: 0.25 (single shared parameter)
    a0 = jnp.full((1, 1), 0.25, jnp.float32)
    a1 = jnp.full((1, 1), 0.25, jnp.float32)

    return (w0, b0, g0, be0, m0, v0, a0,
            w1, b1, g1, be1, m1, v1, a1,
            w2, b2)


def decoder_reference(x, params):
    """Plain-JAX reference of the same eval-mode forward pass (unfolded BN)."""
    (w0, b0, g0, be0, m0, v0, a0,
     w1, b1, g1, be1, m1, v1, a1,
     w2, b2) = params

    def bn_prelu(h, g, be, m, v, a):
        h = (h - m) / jnp.sqrt(v + BN_EPS) * g + be
        return jnp.where(h > 0, h, a * h)

    h = x @ w0 + b0
    h = bn_prelu(h, g0, be0, m0, v0, a0[0, 0])
    h = h @ w1 + b1
    h = bn_prelu(h, g1, be1, m1, v1, a1[0, 0])
    return h @ w2 + b2


if __name__ == "__main__":
    def run_case(idx, batch, latent_dim, hidden_dim, n_genes, *, tm=None, tn=None):
        kx, kp = jax.random.split(jax.random.fold_in(jax.random.PRNGKey(0), idx))
        x = jax.random.normal(kx, (batch, latent_dim), jnp.float32)
        params = make_params(kp, latent_dim, hidden_dim, n_genes)
        out = jax.block_until_ready(decoder_forward(x, params, tm=tm, tn=tn))
        ref = decoder_reference(x, params)
        assert out.shape == (batch, n_genes)
        # Final matmul runs on the bf16 MXU path -> relaxed tolerance.
        assert jnp.allclose(out, ref, atol=1e-2, rtol=1e-2), f"mismatch (case {idx})"

    # Case 0: single batch tile -> h recomputed per step, both axes "parallel".
    run_case(0, batch=8, latent_dim=32, hidden_dim=[64, 64], n_genes=96)
    # Case 1: multi-tile grid -> h cached in VMEM scratch across the n_genes axis.
    run_case(1, batch=24, latent_dim=32, hidden_dim=[64, 64], n_genes=384, tm=8, tn=128)

    print("KERNEL_OK")
</pallas_src>

<mosaic_0001>
module attributes {stable_mosaic.version = 11 : i64} {
  func.func @decoder_kernel(%arg0: i32, %arg1: i32, %arg2: memref<8x128xf32, #tpu.memory_space<vmem>>, %arg3: memref<128x128xf32, #tpu.memory_space<vmem>>, %arg4: memref<1x128xf32, #tpu.memory_space<vmem>>, %arg5: memref<128x128xf32, #tpu.memory_space<vmem>>, %arg6: memref<1x128xf32, #tpu.memory_space<vmem>>, %arg7: memref<128x128xbf16, #tpu.memory_space<vmem>>, %arg8: memref<1x128xf32, #tpu.memory_space<vmem>>, %arg9: memref<2xf32, #tpu.memory_space<smem>>, %arg10: memref<8x128xf32, #tpu.memory_space<vmem>>) attributes {dimension_semantics = [#tpu.dimension_semantics<parallel>, #tpu.dimension_semantics<parallel>], iteration_bounds = array<i64: 1, 1>, scalar_prefetch = 0 : i64, scratch_operands = 0 : i64, tpu.core_type = #tpu.core_type<tc>, window_params = [{transform_indices = @transform_0, window_bounds = array<i64: 8, 128>}, {pipeline_mode = #tpu.pipeline_mode<synchronous>, transform_indices = @transform_1, window_bounds = array<i64: 128, 128>}, {pipeline_mode = #tpu.pipeline_mode<synchronous>, transform_indices = @transform_2, window_bounds = array<i64: 1, 128>}, {pipeline_mode = #tpu.pipeline_mode<synchronous>, transform_indices = @transform_3, window_bounds = array<i64: 128, 128>}, {pipeline_mode = #tpu.pipeline_mode<synchronous>, transform_indices = @transform_4, window_bounds = array<i64: 1, 128>}, {transform_indices = @transform_5, window_bounds = array<i64: 128, 128>}, {transform_indices = @transform_6, window_bounds = array<i64: 1, 128>}, {transform_indices = @transform_7, window_bounds = array<i64: 2>}, {transform_indices = @transform_8, window_bounds = array<i64: 8, 128>}]} {
    %c0 = arith.constant 0 : index
    %0 = memref.load %arg9[%c0] : memref<2xf32, #tpu.memory_space<smem>>
    %c1 = arith.constant 1 : index
    %1 = memref.load %arg9[%c1] : memref<2xf32, #tpu.memory_space<smem>>
    %c0_0 = arith.constant 0 : index
    %c0_1 = arith.constant 0 : index
    %2 = vector.load %arg2[%c0_0, %c0_1] : memref<8x128xf32, #tpu.memory_space<vmem>>, vector<8x128xf32>
    %c0_2 = arith.constant 0 : index
    %c0_3 = arith.constant 0 : index
    %3 = vector.load %arg3[%c0_2, %c0_3] : memref<128x128xf32, #tpu.memory_space<vmem>>, vector<128x128xf32>
    %cst = arith.constant dense<0.000000e+00> : vector<8x128xf32>
    %4 = tpu.matmul %2, %3, %cst {dimension_numbers = #tpu.dot_dimension_numbers<[1], [0], [0], [1], [0, 0, 1, 1], [], []>} : vector<8x128xf32>, vector<128x128xf32>, vector<8x128xf32> -> vector<8x128xf32>
    %c0_4 = arith.constant 0 : index
    %c0_5 = arith.constant 0 : index
    %5 = vector.load %arg4[%c0_4, %c0_5] : memref<1x128xf32, #tpu.memory_space<vmem>>, vector<1x128xf32>
    %6 = vector.broadcast %5 : vector<1x128xf32> to vector<8x128xf32>
    %7 = arith.addf %4, %6 : vector<8x128xf32>
    %cst_6 = arith.constant 0.000000e+00 : f32
    %8 = vector.broadcast %cst_6 : f32 to vector<8x128xf32>
    %9 = arith.cmpf ogt, %7, %8 : vector<8x128xf32>
    %10 = vector.broadcast %0 : f32 to vector<8x128xf32>
    %11 = arith.mulf %10, %7 : vector<8x128xf32>
    %12 = arith.select %9, %7, %11 : vector<8x128xi1>, vector<8x128xf32>
    %c0_7 = arith.constant 0 : index
    %c0_8 = arith.constant 0 : index
    %13 = vector.load %arg5[%c0_7, %c0_8] : memref<128x128xf32, #tpu.memory_space<vmem>>, vector<128x128xf32>
    %cst_9 = arith.constant dense<0.000000e+00> : vector<8x128xf32>
    %14 = tpu.matmul %12, %13, %cst_9 {dimension_numbers = #tpu.dot_dimension_numbers<[1], [0], [0], [1], [0, 0, 1, 1], [], []>} : vector<8x128xf32>, vector<128x128xf32>, vector<8x128xf32> -> vector<8x128xf32>
    %c0_10 = arith.constant 0 : index
    %c0_11 = arith.constant 0 : index
    %15 = vector.load %arg6[%c0_10, %c0_11] : memref<1x128xf32, #tpu.memory_space<vmem>>, vector<1x128xf32>
    %16 = vector.broadcast %15 : vector<1x128xf32> to vector<8x128xf32>
    %17 = arith.addf %14, %16 : vector<8x128xf32>
    %cst_12 = arith.constant 0.000000e+00 : f32
    %18 = vector.broadcast %cst_12 : f32 to vector<8x128xf32>
    %19 = arith.cmpf ogt, %17, %18 : vector<8x128xf32>
    %20 = vector.broadcast %1 : f32 to vector<8x128xf32>
    %21 = arith.mulf %20, %17 : vector<8x128xf32>
    %22 = arith.select %19, %17, %21 : vector<8x128xi1>, vector<8x128xf32>
    %23 = arith.truncf %22 : vector<8x128xf32> to vector<8x128xbf16>
    %c0_13 = arith.constant 0 : index
    %c0_14 = arith.constant 0 : index
    %24 = vector.load %arg7[%c0_13, %c0_14] : memref<128x128xbf16, #tpu.memory_space<vmem>>, vector<128x128xbf16>
    %cst_15 = arith.constant dense<0.000000e+00> : vector<8x128xf32>
    %25 = tpu.matmul %23, %24, %cst_15 {dimension_numbers = #tpu.dot_dimension_numbers<[1], [0], [0], [1], [0, 0, 1, 1], [], []>} : vector<8x128xbf16>, vector<128x128xbf16>, vector<8x128xf32> -> vector<8x128xf32>
    %c0_16 = arith.constant 0 : index
    %c0_17 = arith.constant 0 : index
    %26 = vector.load %arg8[%c0_16, %c0_17] : memref<1x128xf32, #tpu.memory_space<vmem>>, vector<1x128xf32>
    %27 = vector.broadcast %26 : vector<1x128xf32> to vector<8x128xf32>
    %28 = arith.addf %25, %27 : vector<8x128xf32>
    %c0_18 = arith.constant 0 : index
    %c0_19 = arith.constant 0 : index
    %29 = vector.load %arg10[%c0_18, %c0_19] : memref<8x128xf32, #tpu.memory_space<vmem>>, vector<8x128xf32>
    tpu.vector_store %arg10[%c0_18, %c0_19], %28 {strides = array<i32>} : memref<8x128xf32, #tpu.memory_space<vmem>>, vector<8x128xf32>,
    return
  }
  func.func @transform_0(%arg0: i32, %arg1: i32) -> (i32, i32) {
    %c0_i32 = arith.constant 0 : i32
    %c0_i32_0 = arith.constant 0 : i32
    return %arg0, %c0_i32 : i32, i32
  }
  func.func @transform_1(%arg0: i32, %arg1: i32) -> (i32, i32) {
    %c0_i32 = arith.constant 0 : i32
    %c0_i32_0 = arith.constant 0 : i32
    %c0_i32_1 = arith.constant 0 : i32
    return %c0_i32, %c0_i32_0 : i32, i32
  }
  func.func @transform_2(%arg0: i32, %arg1: i32) -> (i32, i32) {
    %c0_i32 = arith.constant 0 : i32
    %c0_i32_0 = arith.constant 0 : i32
    %c0_i32_1 = arith.constant 0 : i32
    return %c0_i32, %c0_i32_0 : i32, i32
  }
  func.func @transform_3(%arg0: i32, %arg1: i32) -> (i32, i32) {
    %c0_i32 = arith.constant 0 : i32
    %c0_i32_0 = arith.constant 0 : i32
    %c0_i32_1 = arith.constant 0 : i32
    return %c0_i32, %c0_i32_0 : i32, i32
  }
  func.func @transform_4(%arg0: i32, %arg1: i32) -> (i32, i32) {
    %c0_i32 = arith.constant 0 : i32
    %c0_i32_0 = arith.constant 0 : i32
    %c0_i32_1 = arith.constant 0 : i32
    return %c0_i32, %c0_i32_0 : i32, i32
  }
  func.func @transform_5(%arg0: i32, %arg1: i32) -> (i32, i32) {
    %c0_i32 = arith.constant 0 : i32
    %c0_i32_0 = arith.constant 0 : i32
    return %c0_i32, %arg1 : i32, i32
  }
  func.func @transform_6(%arg0: i32, %arg1: i32) -> (i32, i32) {
    %c0_i32 = arith.constant 0 : i32
    %c0_i32_0 = arith.constant 0 : i32
    return %c0_i32, %arg1 : i32, i32
  }
  func.func @transform_7(%arg0: i32, %arg1: i32) -> i32 {
    %c0_i32 = arith.constant 0 : i32
    %c0_i32_0 = arith.constant 0 : i32
    return %c0_i32 : i32
  }
  func.func @transform_8(%arg0: i32, %arg1: i32) -> (i32, i32) {
    %c0_i32 = arith.constant 0 : i32
    return %arg0, %arg1 : i32, i32
  }
}

</mosaic_0001>

<bundles_post_ra>
// kernel: tpu_custom_call.1
= control target key start
LH: loop header
LB: loop body
LE: loop exit
PB: predicated region body
PF: predicated region fallthrough
CT: control target
= control target key end

     0   :  { %13 = vsyncpa [#allocation3], 0  ;;  %s937_s0 = inlined_call_operand.hbm [shape: f32[8,128], index: 0, kind: input, shape index: {}]   ;;  %s938_s1 = inlined_call_operand.hbm [shape: f32[128,128], index: 1, kind: input, shape index: {}]   ;;  %s939_s2 = inlined_call_operand.vmem [shape: f32[1,128], index: 2, kind: input, shape index: {}]   ;;  %s940_s3 = inlined_call_operand.hbm [shape: f32[128,128], index: 3, kind: input, shape index: {}]   ;;  %s941_s4 = inlined_call_operand.vmem [shape: f32[1,128], index: 4, kind: input, shape index: {}]   ;;  %s942_s5 = inlined_call_operand.hbm [shape: bf16[128,128], index: 5, kind: input, shape index: {}]   ;;  %s943_s6 = inlined_call_operand.vmem [shape: f32[1,128], index: 6, kind: input, shape index: {}]   ;;  %s944_s7 = inlined_call_operand.vmem [shape: f32[2], index: 7, kind: input, shape index: {}]   ;;  %s945_s8 = inlined_call_operand.hbm [shape: f32[8,128], index: 8, kind: output, shape index: {}]  }
   0x1   :  { %14 = vsyncpa [#allocation7], 0 }
   0x2   :  { %15 = vsyncpa [#allocation10], 0 }
   0x3   :  { %16 = vsyncpa [#allocation5], 0 }
   0x4   :  { %17 = vsyncpa [#allocation4], 0  ;;  %s771_s27 = smov [#allocation6]   ;;  %s639_s9 = scalar_lea.hbm %s938_s1, 2048 }
   0x5   :  { %s33_s28 = sshll.u32 %s771_s27, 4  ;;  %p640_p0 = scmp.ne.s32.totalorder %s938_s1, %s639_s9  ;;  %s34_s28 = int_to_ptr.vmem [resolvable:$true] %s33_s28 }
   0x6   :  { %p643_p1 = scmp.lt.u32.totalorder %s639_s9, %s938_s1 }
   0x8   :  { %p645_p2 = pnand %p643_p1, %p640_p0 }
   0xa   :  { %648 = shalt.err (!%p645_p2)
}
   0xb   :  { %s649_s14 = scalar_lea.vmem %s34_s28, 2048  ;;  %p654_p4 = scmp.lt.s32.totalorder %s34_s28, %s34_s28 }
   0xc   :  { %p650_p3 = scmp.ne.s32.totalorder %s34_s28, %s649_s14  ;;  %p655_p5 = scmp.lt.s32.totalorder %s649_s14, %s649_s14 }
   0xe   :  { %p656_p6 = por %p655_p5, %p654_p4 }
  0x10   :  { %p657_p7 = pnand %p656_p6, %p650_p3 }
  0x12   :  { %660 = shalt.err (!%p657_p7)
}
  0x13   :  { %s772_s15 = smov 128   ;;  %s773_s16 = smov 8  }
  0x14   :  { %39 = dma.hbm_to_vmem [thread:$0]  %s938_s1, 2048, %s34_s28, [#allocation7], %s772_s15, %s772_s15, %s773_s16  }
  0x15   :  { %s774_s19 = smov [#allocation2]   ;;  %s775_s21 = smov [#allocation8]  }
  0x16   :  { %s24_s20 = sshll.u32 %s774_s19, 4  ;;  %s47_s22 = sshll.u32 %s775_s21, 4  ;;  %s25_s20 = int_to_ptr.vmem [resolvable:$true] %s24_s20  ;;  %s48_s22 = int_to_ptr.vmem [resolvable:$true] %s47_s22 }
  0x17   :  { %s661_s25 = scalar_lea.hbm %s937_s0, 128 }
  0x18   :  { %p662_p8 = scmp.ne.s32.totalorder %s937_s0, %s661_s25  ;;  %p665_p9 = scmp.lt.u32.totalorder %s661_s25, %s937_s0 }
  0x1a   :  { %p667_p10 = pnand %p665_p9, %p662_p8 }
  0x1c   :  { %670 = shalt.err (!%p667_p10)
}
  0x1d   :  { %s671_s1 = scalar_lea.vmem %s25_s20, 128  ;;  %p676_p12 = scmp.lt.s32.totalorder %s25_s20, %s25_s20 }
  0x1e   :  { %p672_p11 = scmp.ne.s32.totalorder %s25_s20, %s671_s1  ;;  %p677_p13 = scmp.lt.s32.totalorder %s671_s1, %s671_s1 }
  0x20   :  { %p678_p0 = por %p677_p13, %p676_p12 }
  0x22   :  { %p679_p1 = pnand %p678_p0, %p672_p11 }
  0x24   :  { %682 = shalt.err (!%p679_p1)
}
  0x25   :  { %27 = dma.hbm_to_vmem [thread:$0]  %s937_s0, 128, %s25_s20, [#allocation3]  }
  0x26   :  { %s683_s12 = scalar_lea.hbm %s940_s3, 2048 }
  0x27   :  { %p684_p2 = scmp.ne.s32.totalorder %s940_s3, %s683_s12  ;;  %p687_p3 = scmp.lt.u32.totalorder %s683_s12, %s940_s3 }
  0x29   :  { %p689_p4 = pnand %p687_p3, %p684_p2 }
  0x2b   :  { %692 = shalt.err (!%p689_p4)
}
  0x2c   :  { %s693_s19 = scalar_lea.vmem %s48_s22, 2048  ;;  %p698_p6 = scmp.lt.s32.totalorder %s48_s22, %s48_s22 }
  0x2d   :  { %p694_p5 = scmp.ne.s32.totalorder %s48_s22, %s693_s19  ;;  %p699_p7 = scmp.lt.s32.totalorder %s693_s19, %s693_s19 }
  0x2f   :  { %p700_p8 = por %p699_p7, %p698_p6 }
  0x31   :  { %p701_p9 = pnand %p700_p8, %p694_p5 }
  0x33   :  { %704 = shalt.err (!%p701_p9)
}
  0x34   :  { %53 = dma.hbm_to_vmem [thread:$0]  %s940_s3, 2048, %s48_s22, [#allocation7], %s772_s15, %s772_s15, %s773_s16  }
  0x35   :  { %s776_s21 = smov [#allocation9]   ;;  %s705_s26 = scalar_lea.hbm %s942_s5, 1024 }
  0x36   :  { %s61_s23 = sshll.u32 %s776_s21, 4  ;;  %p706_p10 = scmp.ne.s32.totalorder %s942_s5, %s705_s26  ;;  %s62_s23 = int_to_ptr.vmem [resolvable:$true] %s61_s23 }
  0x37   :  { %p709_p11 = scmp.lt.u32.totalorder %s705_s26, %s942_s5 }
  0x39   :  { %p711_p12 = pnand %p709_p11, %p706_p10 }
  0x3b   :  { %714 = shalt.err (!%p711_p12)
}
  0x3c   :  { %s715_s28 = scalar_lea.vmem %s62_s23, 1024  ;;  %p720_p0 = scmp.lt.s32.totalorder %s62_s23, %s62_s23 }
  0x3d   :  { %p716_p13 = scmp.ne.s32.totalorder %s62_s23, %s715_s28  ;;  %p721_p1 = scmp.lt.s32.totalorder %s715_s28, %s715_s28 }
  0x3f   :  { %p722_p2 = por %p721_p1, %p720_p0 }
  0x41   :  { %p723_p3 = pnand %p722_p2, %p716_p13 }
  0x43   :  { %726 = shalt.err (!%p723_p3)
}
  0x44   :  { %s777_s3 = smov 64   ;;  %s778_s15 = smov 4  }
  0x45   :  { %67 = dma.hbm_to_vmem [thread:$0]  %s942_s5, 1024, %s62_s23, [#allocation10], %s777_s3, %s777_s3, %s778_s15  }
  0x46   :  { %s76_s11 = sshll.u32 %s944_s7, 4  ;;  %s77_s11 = int_to_ptr.vmem [resolvable:$true] %s76_s11 }
  0x47   :  { %s727_s12 = scalar_lea.vmem %s77_s11, 16  ;;  %p732_p5 = scmp.lt.s32.totalorder %s77_s11, %s77_s11 }
  0x48   :  { %p728_p4 = scmp.ne.s32.totalorder %s77_s11, %s727_s12  ;;  %p733_p6 = scmp.lt.s32.totalorder %s727_s12, %s727_s12 }
  0x4a   :  { %p734_p7 = por %p733_p6, %p732_p5 }
  0x4c   :  { %p735_p8 = pnand %p734_p7, %p728_p4 }
  0x4e   :  { %738 = shalt.err (!%p735_p8)
}
  0x4f   :  { %s779_s13 = smov [#allocation11]  }
  0x50   :  { %79 = dma.vmem_to_smem %s77_s11, 16, %s779_s13, [#allocation5]  }
  0x51   :  { %761 = dma.done.wait [#allocation3], 128  }
  0x52   :  { %762 = vsyncadd [#allocation3], 4294967168 }
  0x53   :  { %763 = dma.done.wait [#allocation7], 4096  }
  0x54   :  { %764 = vsyncadd [#allocation7], 4294963200 }
  0x55   :  { %765 = dma.done.wait [#allocation10], 1024  }
  0x56   :  { %766 = vsyncadd [#allocation10], 4294966272 }
  0x57   :  { %767 = dma.done.wait [#allocation5], 16  }
  0x58   :  { %768 = vsyncadd [#allocation5], 4294967280 }
  0x59   :  { %95 = sfence }
  0x5a   :  { %v100_v0 = vld [vmem:[#allocation6] sm:$0xff]  ;;  %v101_v1 = vld [vmem:[#allocation6 + $0x8] sm:$0xff]  ;;  %v102_v2 = vld [vmem:[#allocation6 + $0x10] sm:$0xff]  ;;  %v780_v3 = vmov 0.0|0.0   ;;  %vm781_vm0 = vmmov 0   ;;  %v782_v6 = vmov 0.0  }
  0x5b   :  { %570 = vmatprep.subr.bf16.mxu1 %v780_v3  ;;  %v571_v4 = vpack.c.bf16 %v101_v1, %v100_v0  ;;  %v103_v5 = vld [vmem:[#allocation6 + $0x18] sm:$0xff]  ;;  %512 = vmatprep.mubr.msk.f32.mxu1 %vm781_vm0, %v782_v6  ;;  %v104_v8 = vld [vmem:[#allocation6 + $0x20] sm:$0xff]  ;;  %v105_v9 = vld [vmem:[#allocation6 + $0x28] sm:$0xff]  ;;  %s97_s5 = sld [smem:[#allocation11]]  ;;  %s425_s17 = sld [smem:[#allocation11 + $0x1]] }
  0x5c   :  { %550 = vmatprep.subr.bf16.mxu0 %v782_v6  ;;  %566 = vmatprep.mubr.msk.bf16.mxu0 %vm781_vm0, %v782_v6  ;;  %v574_v7 = vpack.c.bf16 %v103_v5, %v102_v2  ;;  %v577_v10 = vpack.c.bf16 %v105_v9, %v104_v8  ;;  %v106_v11 = vld [vmem:[#allocation6 + $0x30] sm:$0xff]  ;;  %v107_v12 = vld [vmem:[#allocation6 + $0x38] sm:$0xff]  ;;  %v108_v13 = vld [vmem:[#allocation6 + $0x40] sm:$0xff]  ;;  %s783_s20 = smov [#allocation12]  }
  0x5d   :  { %572 = vmatpush3.bf16.msra.mxu1 %v571_v4  ;;  %v109_v14 = vld [vmem:[#allocation6 + $0x48] sm:$0xff]  ;;  %v580_v15 = vpack.c.bf16 %v107_v12, %v106_v11  ;;  %v110_v17 = vld [vmem:[#allocation6 + $0x50] sm:$0xff]  ;;  %v111_v18 = vld [vmem:[#allocation6 + $0x58] sm:$0xff]  ;;  %s413_s21 = sshll.u32 %s783_s20, 4  ;;  %s414_s21 = int_to_ptr.vmem [resolvable:$true] %s413_s21 }
  0x5e   :  { %573 = vmatprep.subr.bf16.mxu1 %v780_v3  ;;  %v583_v16 = vpack.c.bf16 %v109_v14, %v108_v13  ;;  %v586_v19 = vpack.c.bf16 %v111_v18, %v110_v17  ;;  %v112_v20 = vld [vmem:[#allocation6 + $0x60] sm:$0xff]  ;;  %v113_v21 = vld [vmem:[#allocation6 + $0x68] sm:$0xff]  ;;  %v114_v23 = vld [vmem:[#allocation6 + $0x70] sm:$0xff]  ;;  %p744_p10 = scmp.lt.s32.totalorder %s414_s21, %s414_s21 }
  0x5f   :  { %v589_v22 = vpack.c.bf16 %v113_v21, %v112_v20  ;;  %v115_v24 = vld [vmem:[#allocation6 + $0x78] sm:$0xff]  ;;  %v197_v26 = vld [vmem:[#allocation8] sm:$0xff]  ;;  %v198_v27 = vld [vmem:[#allocation8 + $0x8] sm:$0xff] }
  0x60   :  { %v592_v25 = vpack.c.bf16 %v115_v24, %v114_v23  ;;  %v99_v28 = vld [vmem:[#allocation2] sm:$0xff]  ;;  %v595_v29 = vpack.c.bf16 %v198_v27, %v197_v26  ;;  %v199_v30 = vld [vmem:[#allocation8 + $0x10] sm:$0xff]  ;;  %v201_v33 = vld [vmem:[#allocation8 + $0x20] sm:$0xff] }
  0x61   :  { %575 = vmatpush3.bf16.msra.mxu1 %v574_v7  ;;  %v200_v31 = vld [vmem:[#allocation8 + $0x18] sm:$0xff]  ;;  %v202_v34 = vld [vmem:[#allocation8 + $0x28] sm:$0xff]  ;;  %v203_v36 = vld [vmem:[#allocation8 + $0x30] sm:$0xff]  ;;  %v194_v59 = vstv %s97_s5  ;;  %v291_v4 = vstv %s425_s17 }
  0x62   :  { %576 = vmatprep.subr.bf16.mxu1 %v780_v3  ;;  %v598_v32 = vpack.c.bf16 %v200_v31, %v199_v30  ;;  %v601_v35 = vpack.c.bf16 %v202_v34, %v201_v33  ;;  %v204_v37 = vld [vmem:[#allocation8 + $0x38] sm:$0xff]  ;;  %v205_v39 = vld [vmem:[#allocation8 + $0x40] sm:$0xff]  ;;  %v206_v40 = vld [vmem:[#allocation8 + $0x48] sm:$0xff] }
  0x63   :  { %v604_v38 = vpack.c.bf16 %v204_v37, %v203_v36  ;;  %v607_v41 = vpack.c.bf16 %v206_v40, %v205_v39  ;;  %v207_v42 = vld [vmem:[#allocation8 + $0x50] sm:$0xff]  ;;  %v208_v43 = vld [vmem:[#allocation8 + $0x58] sm:$0xff]  ;;  %v209_v45 = vld [vmem:[#allocation8 + $0x60] sm:$0xff] }
  0x64   :  { %v610_v44 = vpack.c.bf16 %v208_v43, %v207_v42  ;;  %v210_v46 = vld [vmem:[#allocation8 + $0x68] sm:$0xff]  ;;  %v211_v48 = vld [vmem:[#allocation8 + $0x70] sm:$0xff]  ;;  %v212_v49 = vld [vmem:[#allocation8 + $0x78] sm:$0xff] }
  0x65   :  { %578 = vmatpush3.bf16.msra.mxu1 %v577_v10  ;;  %v613_v47 = vpack.c.bf16 %v210_v46, %v209_v45  ;;  %v616_v50 = vpack.c.bf16 %v212_v49, %v211_v48  ;;  %v631_v51 = vld [vmem:[#allocation9] sm:$0xff]   ;;  %v632_v52 = vld [vmem:[#allocation9 + $0x8] sm:$0xff]   ;;  %v633_v53 = vld [vmem:[#allocation9 + $0x10] sm:$0xff]  }
  0x66   :  { %579 = vmatprep.subr.bf16.mxu1 %v780_v3  ;;  %551 = vmatpush3.bf16.msra.mxu0 %v631_v51  ;;  %v634_v54 = vld [vmem:[#allocation9 + $0x18] sm:$0xff]   ;;  %v635_v55 = vld [vmem:[#allocation9 + $0x20] sm:$0xff]   ;;  %v636_v56 = vld [vmem:[#allocation9 + $0x28] sm:$0xff]  }
  0x67   :  { %552 = vmatprep.subr.bf16.mxu0 %v782_v6  ;;  %v426_v57 = vld [vmem:[%s939_s2] ss:$0 sm:$0xff]  ;;  %v637_v0 = vld [vmem:[#allocation9 + $0x30] sm:$0xff]  }
  0x68   :  { %v638_v1 = vld [vmem:[#allocation9 + $0x38] sm:$0xff]  }
  0x69   :  { %581 = vmatpush3.bf16.msra.mxu1 %v580_v15  ;;  %v427_v2 = vld [vmem:[%s941_s4] ss:$0 sm:$0xff]  ;;  %s739_s4 = scalar_lea.vmem %s414_s21, 128 }
  0x6a   :  { %582 = vmatprep.subr.bf16.mxu1 %v780_v3  ;;  %553 = vmatpush3.bf16.msra.mxu0 %v632_v52  ;;  %p740_p9 = scmp.ne.s32.totalorder %s414_s21, %s739_s4  ;;  %p745_p11 = scmp.lt.s32.totalorder %s739_s4, %s739_s4 }
  0x6b   :  { %554 = vmatprep.subr.bf16.mxu0 %v782_v6 }
  0x6c   :  { %p746_p12 = por %p745_p11, %p744_p10 }
  0x6d   :  { %584 = vmatpush3.bf16.msra.mxu1 %v583_v16 }
  0x6e   :  { %585 = vmatprep.subr.bf16.mxu1 %v780_v3  ;;  %555 = vmatpush3.bf16.msra.mxu0 %v633_v53  ;;  %p747_p13 = pnand %p746_p12, %p740_p9 }
  0x6f   :  { %556 = vmatprep.subr.bf16.mxu0 %v782_v6 }
  0x71   :  { %587 = vmatpush3.bf16.msra.mxu1 %v586_v19 }
  0x72   :  { %588 = vmatprep.subr.bf16.mxu1 %v780_v3  ;;  %557 = vmatpush3.bf16.msra.mxu0 %v634_v54 }
  0x73   :  { %558 = vmatprep.subr.bf16.mxu0 %v782_v6 }
  0x75   :  { %590 = vmatpush3.bf16.msra.mxu1 %v589_v22 }
  0x76   :  { %591 = vmatprep.subr.bf16.mxu1 %v780_v3  ;;  %559 = vmatpush3.bf16.msra.mxu0 %v635_v55 }
  0x77   :  { %560 = vmatprep.subr.bf16.mxu0 %v782_v6 }
  0x79   :  { %593 = vmatpush3.bf16.msra.mxu1 %v592_v25 }
  0x7a   :  { %594 = vmatprep.subr.bf16.mxu1 %v780_v3  ;;  %561 = vmatpush3.bf16.msra.mxu0 %v636_v56 }
  0x7b   :  { %562 = vmatprep.subr.bf16.mxu0 %v782_v6 }
  0x7c   :  { %513 = vmatmul.mubr.f32.vlgmr.msra.gmra.mrb[0].mxu1 %v99_v28 }
  0x7d   :  { %596 = vmatpush3.bf16.msra.mxu1 %v595_v29  ;;  %547 = vmatprep.mubr.msk.f32.mxu1 %vm781_vm0, %v782_v6 }
  0x7e   :  { %597 = vmatprep.subr.bf16.mxu1 %v780_v3  ;;  %563 = vmatpush3.bf16.msra.mxu0 %v637_v0 }
  0x7f   :  { %564 = vmatprep.subr.bf16.mxu0 %v782_v6  ;;  %v428_v6 = vld [vmem:[%s943_s6] ss:$0 sm:$0xff] }
  0x81   :  { %599 = vmatpush3.bf16.msra.mxu1 %v598_v32 }
  0x82   :  { %600 = vmatprep.subr.bf16.mxu1 %v780_v3  ;;  %565 = vmatpush3.bf16.msra.mxu0 %v638_v1 }
  0x85   :  { %602 = vmatpush3.bf16.msra.mxu1 %v601_v35 }
  0x86   :  { %603 = vmatprep.subr.bf16.mxu1 %v780_v3 }
  0x89   :  { %605 = vmatpush3.bf16.msra.mxu1 %v604_v38 }
  0x8a   :  { %606 = vmatprep.subr.bf16.mxu1 %v780_v3 }
  0x8d   :  { %608 = vmatpush3.bf16.msra.mxu1 %v607_v41 }
  0x8e   :  { %609 = vmatprep.subr.bf16.mxu1 %v780_v3 }
  0x91   :  { %611 = vmatpush3.bf16.msra.mxu1 %v610_v44 }
  0x92   :  { %612 = vmatprep.subr.bf16.mxu1 %v780_v3 }
  0x95   :  { %614 = vmatpush3.bf16.msra.mxu1 %v613_v47 }
  0x96   :  { %615 = vmatprep.subr.bf16.mxu1 %v780_v3 }
  0x99   :  { %617 = vmatpush3.bf16.msra.mxu1 %v616_v50 }
 0x14f   :  { %v189_v58 = vpop.f32.mrb[0].mxu1 }
 0x150   :  { %v190_v60 = vadd.f32 %v426_v57, %v189_v58  ;;  %v514_v61 = vpop.f32.mrb[1].mxu1 }
 0x152   :  { %vm193_vm1 = vcmp.gt.f32.partialorder %v190_v60, 0.0  ;;  %v195_v62 = vmul.f32 %v194_v59, %v190_v60 }
 0x154   :  { %v196_v63 = vsel %vm193_vm1, %v190_v60, %v195_v62 }
 0x155   :  { %548 = vmatmul.mubr.f32.vlgmr.msra.gmra.mrb[2].mxu1 %v196_v63 }
 0x228   :  { %v286_v3 = vpop.f32.mrb[2].mxu1 }
 0x229   :  { %v287_v5 = vadd.f32 %v427_v2, %v286_v3  ;;  %v549_v7 = vpop.f32.mrb[3].mxu1 }
 0x22b   :  { %vm290_vm2 = vcmp.gt.f32.partialorder %v287_v5, 0.0  ;;  %v292_v8 = vmul.f32 %v291_v4, %v287_v5 }
 0x22d   :  { %v293_v9 = vsel %vm290_vm2, %v287_v5, %v292_v8 }
 0x22e   :  { %v294_v10 = vpack.c.bf16 %v293_v9, %v293_v9 }
 0x230   :  { %567 = vmatmul.mubr.bf16.vlgmr.msra.gmra.mrb[0].mxu0 %v294_v10 }
 0x303   :  { %v400_v11 = vpop.f32.mrb[0].mxu0 }
 0x304   :  { %v401_v12 = vadd.f32 %v428_v6, %v400_v11  ;;  %v568_v13 = vpop.f32.mrb[1].mxu0 }
 0x305   :  { %v403_v14 = vpop.f32.mrb[2].mxu0 }
 0x306   :  { %406 = vst [vmem:[#allocation12] sm:$0xff] %v401_v12  ;;  %v569_v15 = vpop.f32.mrb[3].mxu0 }
 0x307   :  { %750 = shalt.err (!%p747_p13)
}
 0x308   :  { %s751_s6 = scalar_lea.hbm %s945_s8, 128 }
 0x309   :  { %p752_p0 = scmp.ne.s32.totalorder %s945_s8, %s751_s6  ;;  %p755_p1 = scmp.lt.u32.totalorder %s751_s6, %s945_s8 }
 0x30b   :  { %p757_p2 = pnand %p755_p1, %p752_p0 }
 0x30d   :  { %760 = shalt.err (!%p757_p2)
}
 0x30e   :  { %416 = dma.vmem_to_hbm [thread:$0]  %s414_s21, 128, %s945_s8, [#allocation4]  }
 0x30f   :  { %769 = dma.done.wait [#allocation4], 128  }
 0x310   :  { %770 = vsyncadd [#allocation4], 4294967168 }
 0x311   :  { %420 = vsyncpa [#allocation3], 1 }
 0x312   :  { %421 = vsyncpa [#allocation7], 1 }
 0x313   :  { %422 = vsyncpa [#allocation10], 1 }
 0x314   :  { %423 = vsyncpa [#allocation4], 1 }
 0x315   :  { %424 = vsyncpa [#allocation5], 1 }

</bundles_post_ra>
